<compile_context>
chip_gen: v7x
topology: tpu7x:2x2x1
jax: 0.10.0
libtpu: 0.0.40
codegen_flags: <defaults>
</compile_context>

<pallas_src>
import jax
import jax.numpy as jnp
from jax.experimental import pallas as pl
from jax.experimental.pallas import tpu as pltpu


_ACT_MAP = {
    "relu": lambda v: jnp.maximum(v, 0.0),
    "tanh": jnp.tanh,
    # torch.nn.GELU defaults to the exact erf form, not the tanh approximation.
    "gelu": lambda v: jax.nn.gelu(v, approximate=False),
    "sigmoid": jax.nn.sigmoid,
}

_VMEM_HARD_LIMIT = 60 << 20   # stay under v7x's 64 MiB physical VMEM


def _make_mlp_kernel(num_layers, activation):
    """Fused kernel: hidden layers are Linear + activation, last is Linear."""
    act_fn = _ACT_MAP[activation]

    def kernel(*refs):
        # refs = (x_ref, w0, b0, w1, b1, ..., w_{L-1}, b_{L-1}, o_ref)
        x_ref, o_ref = refs[0], refs[-1]
        wb = refs[1:-1]
        h = x_ref[...].astype(jnp.float32)
        for i in range(num_layers):
            w_ref = wb[2 * i]              # (in_i, out_i) bf16
            b_ref = wb[2 * i + 1]          # (1, out_i)  f32 — lane-aligned add
            # bf16 x bf16 MXU matmul, f32 accumulation; elementwise in f32.
            h = jnp.dot(h.astype(jnp.bfloat16), w_ref[...],
                        preferred_element_type=jnp.float32) + b_ref[...]
            if i < num_layers - 1:
                h = act_fn(h)
        o_ref[...] = h.astype(o_ref.dtype)

    return kernel


def _vmem_footprint_bytes(block_m, dims):
    """Resident VMEM estimate: bf16 weights + f32 biases (single-buffered,
    constant index_map) + widest f32 activation slab + double-buffered
    input/output blocks."""
    w_bytes = sum(di * do * 2 for di, do in zip(dims[:-1], dims[1:]))
    b_bytes = sum(do * 4 for do in dims[1:])
    act_bytes = block_m * max(dims) * 4
    io_bytes = 2 * (block_m * dims[0] * 4 + block_m * dims[-1] * 4)
    return w_bytes + b_bytes + act_bytes + io_bytes


def mlp_forward(x, weights, biases, activation="relu"):
    """x: (N, ...) -> flatten(start_dim=1) -> fused MLP kernel -> (N, out_dim).

    `weights[i]`: (in_i, out_i) bfloat16 (PyTorch weight, transposed + cast
    once in make_params).  `biases[i]`: (1, out_i) float32.
    """
    n = x.shape[0]
    xf = x.reshape(n, -1)                  # PyTorch flatten(start_dim=1)
    num_layers = len(weights)
    in_dim = weights[0].shape[0]
    out_dim = weights[-1].shape[1]
    dims = [in_dim] + [w.shape[1] for w in weights]
    assert xf.shape[1] == in_dim, (xf.shape, in_dim)

    # Batch grid: one block at small N, 128-row blocks (parallel) at large N
    # so v7x can shard rows across its 2 TensorCores.  Weights/biases use
    # constant index_maps -> VMEM-resident across grid steps.
    block_m = n if n <= 128 else 128
    grid = (pl.cdiv(n, block_m),)

    vmem_need = _vmem_footprint_bytes(block_m, dims)
    assert vmem_need < _VMEM_HARD_LIMIT, (
        f"MLP resident footprint {vmem_need} B exceeds VMEM budget; "
        f"tile K / hidden dims before scaling this kernel up.")
    vmem_limit = min(_VMEM_HARD_LIMIT, max(2 * vmem_need, 4 << 20))

    args = [xf]
    in_specs = [pl.BlockSpec((block_m, in_dim), lambda i: (i, 0))]
    for w, b in zip(weights, biases):
        args.append(w)
        in_specs.append(pl.BlockSpec(w.shape, lambda i: (0, 0)))
        args.append(b)
        in_specs.append(pl.BlockSpec(b.shape, lambda i: (0, 0)))
    out_specs = pl.BlockSpec((block_m, out_dim), lambda i: (i, 0))

    # Advisory cost for XLA's scheduler.
    flops = 2 * n * sum(di * do for di, do in zip(dims[:-1], dims[1:]))
    transcendentals = 0 if activation == "relu" else n * sum(dims[1:-1])
    bytes_accessed = (sum(w.size * 2 for w in weights)
                      + sum(b.size * 4 for b in biases)
                      + xf.size * 4 + n * out_dim * 4)

    return pl.pallas_call(
        _make_mlp_kernel(num_layers, activation),
        out_shape=jax.ShapeDtypeStruct((n, out_dim), x.dtype),
        grid=grid,
        in_specs=in_specs,
        out_specs=out_specs,
        compiler_params=pltpu.CompilerParams(
            dimension_semantics=("parallel",),
            vmem_limit_bytes=vmem_limit),
        cost_estimate=pl.CostEstimate(
            flops=flops, transcendentals=transcendentals,
            bytes_accessed=bytes_accessed),
    )(*args)


# --------------------------- deterministic params ---------------------------
def make_params(key, layers_dim):
    """Build params matching torch.nn.Linear, then (once, on device) transpose
    to (in, out) and cast weights to bf16; biases stay f32 as (1, D) slabs."""
    weights, biases = [], []
    k = key
    for d_in, d_out in zip(layers_dim[:-1], layers_dim[1:]):
        k, kw, kb = jax.random.split(k, 3)
        w_pt = jax.random.normal(kw, (d_out, d_in), jnp.float32) * 0.05  # torch (out,in)
        b = jax.random.normal(kb, (d_out,), jnp.float32) * 0.05
        weights.append(jnp.transpose(w_pt).astype(jnp.bfloat16))        # (in,out) bf16
        biases.append(b.reshape(1, -1))                                  # (1,out) f32
    return weights, biases


def _reference_forward(x, weights, biases, activation="relu"):
    """Pure-JAX reference with the same mixed precision (bf16 matmul inputs,
    f32 accumulation and elementwise) as the kernel."""
    act_fn = _ACT_MAP[activation]
    h = x.reshape(x.shape[0], -1).astype(jnp.float32)
    for i, (w, b) in enumerate(zip(weights, biases)):
        h = jnp.dot(h.astype(jnp.bfloat16), w,
                    preferred_element_type=jnp.float32) + b
        if i < len(weights) - 1:
            h = act_fn(h)
    return h


if __name__ == "__main__":
    key = jax.random.PRNGKey(0)

    # Small shapes consistent with the module: batch=2, channels=4, spatial=16
    # -> flatten(start_dim=1) gives 4*16*16 = 1024 input features.
    N, C, H, W = 2, 4, 16, 16
    layers_dim = [C * H * W, 128, 32, 10]   # 2 hidden Linear+ReLU, final Linear
    activation = "relu"

    kx, kp = jax.random.split(key)
    x = jax.random.normal(kx, (N, C, H, W), jnp.float32)
    weights, biases = make_params(kp, layers_dim)

    out = mlp_forward(x, weights, biases, activation)
    out = jax.block_until_ready(out)
    assert out.shape == (N, layers_dim[-1]), out.shape

    # Numerical check against a pure-JAX reference using identical precision.
    ref = _reference_forward(x, weights, biases, activation)
    assert jnp.allclose(out, ref, atol=2e-3, rtol=2e-3), float(
        jnp.max(jnp.abs(out - ref)))

    print("KERNEL_OK")
</pallas_src>

<mosaic_0001>
module attributes {stable_mosaic.version = 11 : i64} {
  func.func @kernel(%arg0: i32, %arg1: memref<2x1024xf32, #tpu.memory_space<vmem>>, %arg2: memref<1024x128xbf16, #tpu.memory_space<vmem>>, %arg3: memref<1x128xf32, #tpu.memory_space<vmem>>, %arg4: memref<128x32xbf16, #tpu.memory_space<vmem>>, %arg5: memref<1x32xf32, #tpu.memory_space<vmem>>, %arg6: memref<32x10xbf16, #tpu.memory_space<vmem>>, %arg7: memref<1x10xf32, #tpu.memory_space<vmem>>, %arg8: memref<2x10xf32, #tpu.memory_space<vmem>>) attributes {dimension_semantics = [#tpu.dimension_semantics<parallel>], iteration_bounds = array<i64: 1>, scalar_prefetch = 0 : i64, scratch_operands = 0 : i64, tpu.core_type = #tpu.core_type<tc>, window_params = [{transform_indices = @transform_0, window_bounds = array<i64: 2, 1024>}, {pipeline_mode = #tpu.pipeline_mode<synchronous>, transform_indices = @transform_1, window_bounds = array<i64: 1024, 128>}, {pipeline_mode = #tpu.pipeline_mode<synchronous>, transform_indices = @transform_2, window_bounds = array<i64: 1, 128>}, {pipeline_mode = #tpu.pipeline_mode<synchronous>, transform_indices = @transform_3, window_bounds = array<i64: 128, 32>}, {pipeline_mode = #tpu.pipeline_mode<synchronous>, transform_indices = @transform_4, window_bounds = array<i64: 1, 32>}, {pipeline_mode = #tpu.pipeline_mode<synchronous>, transform_indices = @transform_5, window_bounds = array<i64: 32, 10>}, {pipeline_mode = #tpu.pipeline_mode<synchronous>, transform_indices = @transform_6, window_bounds = array<i64: 1, 10>}, {transform_indices = @transform_7, window_bounds = array<i64: 2, 10>}]} {
    %c0 = arith.constant 0 : index
    %c0_0 = arith.constant 0 : index
    %0 = vector.load %arg1[%c0, %c0_0] : memref<2x1024xf32, #tpu.memory_space<vmem>>, vector<2x1024xf32>
    %1 = arith.truncf %0 : vector<2x1024xf32> to vector<2x1024xbf16>
    %c0_1 = arith.constant 0 : index
    %c0_2 = arith.constant 0 : index
    %2 = vector.load %arg2[%c0_1, %c0_2] : memref<1024x128xbf16, #tpu.memory_space<vmem>>, vector<1024x128xbf16>
    %cst = arith.constant dense<0.000000e+00> : vector<2x128xf32>
    %3 = tpu.matmul %1, %2, %cst {dimension_numbers = #tpu.dot_dimension_numbers<[1], [0], [0], [1], [0, 0, 1, 1], [], []>} : vector<2x1024xbf16>, vector<1024x128xbf16>, vector<2x128xf32> -> vector<2x128xf32>
    %c0_3 = arith.constant 0 : index
    %c0_4 = arith.constant 0 : index
    %4 = vector.load %arg3[%c0_3, %c0_4] : memref<1x128xf32, #tpu.memory_space<vmem>>, vector<1x128xf32>
    %5 = vector.broadcast %4 : vector<1x128xf32> to vector<2x128xf32>
    %6 = arith.addf %3, %5 : vector<2x128xf32>
    %cst_5 = arith.constant 0.000000e+00 : f32
    %7 = vector.broadcast %cst_5 : f32 to vector<2x128xf32>
    %8 = arith.maximumf %6, %7 : vector<2x128xf32>
    %9 = arith.truncf %8 : vector<2x128xf32> to vector<2x128xbf16>
    %c0_6 = arith.constant 0 : index
    %c0_7 = arith.constant 0 : index
    %10 = vector.load %arg4[%c0_6, %c0_7] : memref<128x32xbf16, #tpu.memory_space<vmem>>, vector<128x32xbf16>
    %cst_8 = arith.constant dense<0.000000e+00> : vector<2x32xf32>
    %11 = tpu.matmul %9, %10, %cst_8 {dimension_numbers = #tpu.dot_dimension_numbers<[1], [0], [0], [1], [0, 0, 1, 1], [], []>} : vector<2x128xbf16>, vector<128x32xbf16>, vector<2x32xf32> -> vector<2x32xf32>
    %c0_9 = arith.constant 0 : index
    %c0_10 = arith.constant 0 : index
    %12 = vector.load %arg5[%c0_9, %c0_10] : memref<1x32xf32, #tpu.memory_space<vmem>>, vector<1x32xf32>
    %13 = vector.broadcast %12 : vector<1x32xf32> to vector<2x32xf32>
    %14 = arith.addf %11, %13 : vector<2x32xf32>
    %cst_11 = arith.constant 0.000000e+00 : f32
    %15 = vector.broadcast %cst_11 : f32 to vector<2x32xf32>
    %16 = arith.maximumf %14, %15 : vector<2x32xf32>
    %17 = arith.truncf %16 : vector<2x32xf32> to vector<2x32xbf16>
    %c0_12 = arith.constant 0 : index
    %c0_13 = arith.constant 0 : index
    %18 = vector.load %arg6[%c0_12, %c0_13] : memref<32x10xbf16, #tpu.memory_space<vmem>>, vector<32x10xbf16>
    %cst_14 = arith.constant dense<0.000000e+00> : vector<2x10xf32>
    %19 = tpu.matmul %17, %18, %cst_14 {dimension_numbers = #tpu.dot_dimension_numbers<[1], [0], [0], [1], [0, 0, 1, 1], [], []>} : vector<2x32xbf16>, vector<32x10xbf16>, vector<2x10xf32> -> vector<2x10xf32>
    %c0_15 = arith.constant 0 : index
    %c0_16 = arith.constant 0 : index
    %20 = vector.load %arg7[%c0_15, %c0_16] : memref<1x10xf32, #tpu.memory_space<vmem>>, vector<1x10xf32>
    %21 = vector.broadcast %20 : vector<1x10xf32> to vector<2x10xf32>
    %22 = arith.addf %19, %21 : vector<2x10xf32>
    %c0_17 = arith.constant 0 : index
    %c0_18 = arith.constant 0 : index
    %23 = vector.load %arg8[%c0_17, %c0_18] : memref<2x10xf32, #tpu.memory_space<vmem>>, vector<2x10xf32>
    tpu.vector_store %arg8[%c0_17, %c0_18], %22 {strides = array<i32>} : memref<2x10xf32, #tpu.memory_space<vmem>>, vector<2x10xf32>,
    return
  }
  func.func @transform_0(%arg0: i32) -> (i32, i32) {
    %c0_i32 = arith.constant 0 : i32
    %c0_i32_0 = arith.constant 0 : i32
    return %arg0, %c0_i32 : i32, i32
  }
  func.func @transform_1(%arg0: i32) -> (i32, i32) {
    %c0_i32 = arith.constant 0 : i32
    %c0_i32_0 = arith.constant 0 : i32
    %c0_i32_1 = arith.constant 0 : i32
    return %c0_i32, %c0_i32_0 : i32, i32
  }
  func.func @transform_2(%arg0: i32) -> (i32, i32) {
    %c0_i32 = arith.constant 0 : i32
    %c0_i32_0 = arith.constant 0 : i32
    %c0_i32_1 = arith.constant 0 : i32
    return %c0_i32, %c0_i32_0 : i32, i32
  }
  func.func @transform_3(%arg0: i32) -> (i32, i32) {
    %c0_i32 = arith.constant 0 : i32
    %c0_i32_0 = arith.constant 0 : i32
    %c0_i32_1 = arith.constant 0 : i32
    return %c0_i32, %c0_i32_0 : i32, i32
  }
  func.func @transform_4(%arg0: i32) -> (i32, i32) {
    %c0_i32 = arith.constant 0 : i32
    %c0_i32_0 = arith.constant 0 : i32
    %c0_i32_1 = arith.constant 0 : i32
    return %c0_i32, %c0_i32_0 : i32, i32
  }
  func.func @transform_5(%arg0: i32) -> (i32, i32) {
    %c0_i32 = arith.constant 0 : i32
    %c0_i32_0 = arith.constant 0 : i32
    %c0_i32_1 = arith.constant 0 : i32
    return %c0_i32, %c0_i32_0 : i32, i32
  }
  func.func @transform_6(%arg0: i32) -> (i32, i32) {
    %c0_i32 = arith.constant 0 : i32
    %c0_i32_0 = arith.constant 0 : i32
    %c0_i32_1 = arith.constant 0 : i32
    return %c0_i32, %c0_i32_0 : i32, i32
  }
  func.func @transform_7(%arg0: i32) -> (i32, i32) {
    %c0_i32 = arith.constant 0 : i32
    %c0_i32_0 = arith.constant 0 : i32
    return %arg0, %c0_i32 : i32, i32
  }
}

</mosaic_0001>

<bundles_post_ra>
// kernel: tpu_custom_call.1
= control target key start
LH: loop header
LB: loop body
LE: loop exit
PB: predicated region body
PF: predicated region fallthrough
CT: control target
= control target key end

     0   :  { %12 = vsyncpa [#allocation3], 0  ;;  %s1433_s0 = inlined_call_operand.vmem [shape: f32[2,1024], index: 0, kind: input, shape index: {}]   ;;  %s1434_s1 = inlined_call_operand.hbm [shape: bf16[1024,128], index: 1, kind: input, shape index: {}]   ;;  %s1435_s2 = inlined_call_operand.vmem [shape: f32[1,128], index: 2, kind: input, shape index: {}]   ;;  %s1436_s3 = inlined_call_operand.vmem [shape: bf16[128,32], index: 3, kind: input, shape index: {}]   ;;  %s1437_s4 = inlined_call_operand.vmem [shape: f32[1,32], index: 4, kind: input, shape index: {}]   ;;  %s1438_s5 = inlined_call_operand.vmem [shape: bf16[32,10], index: 5, kind: input, shape index: {}]   ;;  %s1439_s6 = inlined_call_operand.vmem [shape: f32[1,10], index: 6, kind: input, shape index: {}]   ;;  %s1440_s7 = inlined_call_operand.hbm [shape: f32[2,10], index: 7, kind: output, shape index: {}]  }
   0x1   :  { %13 = vsyncpa [#allocation4], 0  ;;  %s1311_s24 = smov [#allocation2]   ;;  %s1263_s28 = scalar_lea.hbm %s1434_s1, 8192 }
   0x2   :  { %s21_s25 = sshll.u32 %s1311_s24, 4  ;;  %p1264_p0 = scmp.ne.s32.totalorder %s1434_s1, %s1263_s28  ;;  %s22_s25 = int_to_ptr.vmem [resolvable:$true] %s21_s25 }
   0x3   :  { %p1267_p1 = scmp.lt.u32.totalorder %s1263_s28, %s1434_s1 }
   0x5   :  { %p1269_p2 = pnand %p1267_p1, %p1264_p0 }
   0x7   :  { %1272 = shalt.err (!%p1269_p2)
}
   0x8   :  { %s1273_s10 = scalar_lea.vmem %s22_s25, 8192  ;;  %p1278_p4 = scmp.lt.s32.totalorder %s22_s25, %s22_s25 }
   0x9   :  { %p1274_p3 = scmp.ne.s32.totalorder %s22_s25, %s1273_s10  ;;  %p1279_p5 = scmp.lt.s32.totalorder %s1273_s10, %s1273_s10 }
   0xb   :  { %p1280_p6 = por %p1279_p5, %p1278_p4 }
   0xd   :  { %p1281_p7 = pnand %p1280_p6, %p1274_p3 }
   0xf   :  { %1284 = shalt.err (!%p1281_p7)
}
  0x10   :  { %s1312_s11 = smov 64   ;;  %s1313_s12 = smov 4  }
  0x11   :  { %27 = dma.hbm_to_vmem [thread:$0]  %s1434_s1, 8192, %s22_s25, [#allocation3], %s1312_s11, %s1312_s11, %s1313_s12  }
  0x12   :  { %1307 = dma.done.wait [#allocation3], 8192  }
  0x13   :  { %1308 = vsyncadd [#allocation3], 4294959104  ;;  %v1187_v0 = vld [vmem:[#allocation2 + $0x40] sm:$0xff]   ;;  %v1191_v4 = vld [vmem:[#allocation2 + $0x48] sm:$0xff]   ;;  %v1314_v22 = vmov 1983009808   ;;  %v50_v24 = vlaneseq }
  0x14   :  { %v1188_v1 = vld [vmem:[#allocation2 + $0xc0] sm:$0xff]   ;;  %1052 = vmatprep.subr.bf16.mxu0 %v1187_v0  ;;  %v1192_v5 = vld [vmem:[#allocation2 + $0xc8] sm:$0xff]   ;;  %v1195_v8 = vld [vmem:[#allocation2 + $0x50] sm:$0xff]   ;;  %v48_v23 = vunpack.c.l.s4 %v1314_v22  ;;  %vm1316_vm0 = vmmov 0   ;;  %vm913_vm1 = vcmask 261120   ;;  %s1317_s17 = smov [#allocation5]  }
  0x15   :  { %v1189_v2 = vld [vmem:[#allocation2] sm:$0xff]   ;;  %1074 = vmatprep.subr.bf16.mxu1 %v1188_v1  ;;  %v1193_v6 = vld [vmem:[#allocation2 + $0x8] sm:$0xff]   ;;  %v1196_v9 = vld [vmem:[#allocation2 + $0xd0] sm:$0xff]   ;;  %v51_v30 = vshrl.u32 %v50_v24, 7  ;;  %vm957_vm2 = vcmask 74752  }
  0x16   :  { %v1190_v3 = vld [vmem:[#allocation2 + $0x80] sm:$0xff]   ;;  %1053 = vmatpush3.bf16.msra.mxu0 %v1189_v2  ;;  %v1194_v7 = vld [vmem:[#allocation2 + $0x88] sm:$0xff]   ;;  %v1197_v10 = vld [vmem:[#allocation2 + $0x10] sm:$0xff]   ;;  %v49_v29 = vunpack.c.0.s8 %v48_v23 }
  0x17   :  { %1075 = vmatpush3.bf16.msra.mxu1 %v1190_v3  ;;  %1054 = vmatprep.subr.bf16.mxu0 %v1191_v4  ;;  %v1198_v11 = vld [vmem:[#allocation2 + $0x90] sm:$0xff]   ;;  %v1199_v12 = vld [vmem:[#allocation2 + $0x58] sm:$0xff]   ;;  %v1203_v16 = vld [vmem:[#allocation2 + $0x60] sm:$0xff]  }
  0x18   :  { %1076 = vmatprep.subr.bf16.mxu1 %v1192_v5  ;;  %v1200_v13 = vld [vmem:[#allocation2 + $0xd8] sm:$0xff]   ;;  %v1204_v17 = vld [vmem:[#allocation2 + $0xe0] sm:$0xff]   ;;  %v1207_v20 = vld [vmem:[#allocation2 + $0x68] sm:$0xff]   ;;  %v1370_v35 = vsub.s32 %v49_v29, %v51_v30 }
  0x19   :  { %v1201_v14 = vld [vmem:[#allocation2 + $0x18] sm:$0xff]   ;;  %v1205_v18 = vld [vmem:[#allocation2 + $0x20] sm:$0xff]   ;;  %v1208_v21 = vld [vmem:[#allocation2 + $0xe8] sm:$0xff]  }
  0x1a   :  { %1055 = vmatpush3.bf16.msra.mxu0 %v1193_v6  ;;  %v1202_v15 = vld [vmem:[#allocation2 + $0x98] sm:$0xff]   ;;  %v1206_v19 = vld [vmem:[#allocation2 + $0xa0] sm:$0xff]   ;;  %v1209_v25 = vld [vmem:[#allocation2 + $0x28] sm:$0xff]  }
  0x1b   :  { %1077 = vmatpush3.bf16.msra.mxu1 %v1194_v7  ;;  %1056 = vmatprep.subr.bf16.mxu0 %v1195_v8  ;;  %v1210_v26 = vld [vmem:[#allocation2 + $0xa8] sm:$0xff]   ;;  %v1211_v27 = vld [vmem:[#allocation2 + $0x70] sm:$0xff]   ;;  %v1215_v33 = vld [vmem:[#allocation2 + $0x78] sm:$0xff]  }
  0x1c   :  { %1078 = vmatprep.subr.bf16.mxu1 %v1196_v9  ;;  %v1212_v28 = vld [vmem:[#allocation2 + $0xf0] sm:$0xff]   ;;  %v1216_v34 = vld [vmem:[#allocation2 + $0xf8] sm:$0xff]   ;;  %v42_v38 = vld [vmem:[%s1433_s0] sm:$0xff] }
  0x1d   :  { %v1213_v31 = vld [vmem:[#allocation2 + $0x30] sm:$0xff]   ;;  %v1217_v36 = vld [vmem:[#allocation2 + $0x38] sm:$0xff]   ;;  %v53_v39 = vrot.slane %v42_v38, %v1370_v35  ;;  %v46_v40 = vcombine.high %v42_v38, %v42_v38  ;;  %v1220_v41 = vld [vmem:[#allocation2 + $0x140] sm:$0xff]  }
  0x1e   :  { %1057 = vmatpush3.bf16.msra.mxu0 %v1197_v10  ;;  %v1214_v32 = vld [vmem:[#allocation2 + $0xb0] sm:$0xff]   ;;  %v1218_v37 = vld [vmem:[#allocation2 + $0xb8] sm:$0xff]   ;;  %v1221_v42 = vld [vmem:[#allocation2 + $0x1c0] sm:$0xff]  }
  0x1f   :  { %1079 = vmatpush3.bf16.msra.mxu1 %v1198_v11  ;;  %1058 = vmatprep.subr.bf16.mxu0 %v1199_v12  ;;  %v61_v43 = vcombine.high %v53_v39, %v53_v39  ;;  %v60_v44 = vrot.slane %v46_v40, %v1370_v35  ;;  %v88_v45 = vpack.c.bf16 %v53_v39, %v53_v39  ;;  %v1222_v46 = vld [vmem:[#allocation2 + $0x100] sm:$0xff]   ;;  %v1224_v51 = vld [vmem:[#allocation2 + $0x148] sm:$0xff]   ;;  %v1228_v56 = vld [vmem:[#allocation2 + $0x150] sm:$0xff]  }
  0x20   :  { %1080 = vmatprep.subr.bf16.mxu1 %v1200_v13  ;;  %v1223_v49 = vld [vmem:[#allocation2 + $0x180] sm:$0xff]   ;;  %v1225_v53 = vld [vmem:[#allocation2 + $0x1c8] sm:$0xff]   ;;  %v1229_v57 = vld [vmem:[#allocation2 + $0x1d0] sm:$0xff]  }
  0x21   :  { %v89_v47 = vpack.c.bf16 %v61_v43, %v61_v43  ;;  %v62_v48 = vcombine.high %v60_v44, %v60_v44  ;;  %v90_v50 = vpack.c.bf16 %v60_v44, %v60_v44  ;;  %v1226_v54 = vld [vmem:[#allocation2 + $0x108] sm:$0xff]   ;;  %v1230_v58 = vld [vmem:[#allocation2 + $0x110] sm:$0xff]   ;;  %v1232_v60 = vld [vmem:[#allocation2 + $0x158] sm:$0xff]  }
  0x22   :  { %1059 = vmatpush3.bf16.msra.mxu0 %v1201_v14  ;;  %v1227_v55 = vld [vmem:[#allocation2 + $0x188] sm:$0xff]   ;;  %v1231_v59 = vld [vmem:[#allocation2 + $0x190] sm:$0xff]   ;;  %v1233_v61 = vld [vmem:[#allocation2 + $0x1d8] sm:$0xff]  }
  0x23   :  { %1081 = vmatpush3.bf16.msra.mxu1 %v1202_v15  ;;  %1060 = vmatprep.subr.bf16.mxu0 %v1203_v16  ;;  %v91_v52 = vpack.c.bf16 %v62_v48, %v62_v48  ;;  %v1234_v62 = vld [vmem:[#allocation2 + $0x118] sm:$0xff]   ;;  %v1236_v0 = vld [vmem:[#allocation2 + $0x160] sm:$0xff]   ;;  %v1240_v4 = vld [vmem:[#allocation2 + $0x168] sm:$0xff]  }
  0x24   :  { %1082 = vmatprep.subr.bf16.mxu1 %v1204_v17  ;;  %647 = vmatprep.mubr.bf16.mxu0 %v89_v47  ;;  %v1235_v63 = vld [vmem:[#allocation2 + $0x198] sm:$0xff]   ;;  %v1237_v1 = vld [vmem:[#allocation2 + $0x1e0] sm:$0xff]   ;;  %v1241_v5 = vld [vmem:[#allocation2 + $0x1e8] sm:$0xff]  }
  0x25   :  { %687 = vmatprep.mubr.bf16.mxu1 %v91_v52  ;;  %v1238_v2 = vld [vmem:[#allocation2 + $0x120] sm:$0xff]   ;;  %v1242_v6 = vld [vmem:[#allocation2 + $0x128] sm:$0xff]   ;;  %v1244_v8 = vld [vmem:[#allocation2 + $0x170] sm:$0xff]  }
  0x26   :  { %1061 = vmatpush3.bf16.msra.mxu0 %v1205_v18  ;;  %v1239_v3 = vld [vmem:[#allocation2 + $0x1a0] sm:$0xff]   ;;  %v1243_v7 = vld [vmem:[#allocation2 + $0x1a8] sm:$0xff]   ;;  %v1245_v9 = vld [vmem:[#allocation2 + $0x1f0] sm:$0xff]  }
  0x27   :  { %1083 = vmatpush3.bf16.msra.mxu1 %v1206_v19  ;;  %1062 = vmatprep.subr.bf16.mxu0 %v1207_v20  ;;  %v1246_v10 = vld [vmem:[#allocation2 + $0x130] sm:$0xff]   ;;  %v1248_v12 = vld [vmem:[#allocation2 + $0x178] sm:$0xff]   ;;  %v43_v15 = vld [vmem:[%s1433_s0 + $0x8] sm:$0xff] }
  0x28   :  { %1084 = vmatprep.subr.bf16.mxu1 %v1208_v21  ;;  %v1247_v11 = vld [vmem:[#allocation2 + $0x1b0] sm:$0xff]   ;;  %v1249_v13 = vld [vmem:[#allocation2 + $0x1f8] sm:$0xff]   ;;  %v70_v17 = vrot.slane %v43_v15, %v1370_v35  ;;  %v63_v18 = vcombine.high %v43_v15, %v43_v15 }
  0x29   :  { %v1250_v14 = vld [vmem:[#allocation2 + $0x138] sm:$0xff]   ;;  %v1255_v29 = vld [vmem:[%s1436_s3 + $0x10] sm:$0xff]  }
  0x2a   :  { %1063 = vmatpush3.bf16.msra.mxu0 %v1209_v25  ;;  %v1251_v16 = vld [vmem:[#allocation2 + $0x1b8] sm:$0xff]   ;;  %v78_v19 = vcombine.high %v70_v17, %v70_v17  ;;  %v77_v20 = vrot.slane %v63_v18, %v1370_v35  ;;  %v92_v21 = vpack.c.bf16 %v70_v17, %v70_v17  ;;  %v1261_v35 = vld [vmem:[%s1438_s5] sm:$0xff]  }
  0x2b   :  { %1085 = vmatpush3.bf16.msra.mxu1 %v1210_v26  ;;  %1064 = vmatprep.subr.bf16.mxu0 %v1211_v27  ;;  %v1253_v26 = vld [vmem:[%s1436_s3] sm:$0xff]   ;;  %v1315_v27 = vmov 0.0   ;;  %v1256_v30 = vld [vmem:[%s1436_s3 + $0x18] sm:$0xff]  }
  0x2c   :  { %1086 = vmatprep.subr.bf16.mxu1 %v1212_v28  ;;  %v93_v22 = vpack.c.bf16 %v78_v19, %v78_v19  ;;  %v79_v23 = vcombine.high %v77_v20, %v77_v20  ;;  %v94_v24 = vpack.c.bf16 %v77_v20, %v77_v20  ;;  %v1254_v28 = vld [vmem:[%s1436_s3 + $0x8] sm:$0xff]  }
  0x2e   :  { %1065 = vmatpush3.bf16.msra.mxu0 %v1213_v31  ;;  %v95_v25 = vpack.c.bf16 %v79_v23, %v79_v23  ;;  %v1257_v31 = vld [vmem:[%s1436_s3 + $0x20] sm:$0xff]  }
  0x2f   :  { %1087 = vmatpush3.bf16.msra.mxu1 %v1214_v32  ;;  %1066 = vmatprep.subr.bf16.mxu0 %v1215_v33  ;;  %v1258_v32 = vld [vmem:[%s1436_s3 + $0x28] sm:$0xff]   ;;  %v1259_v33 = vld [vmem:[%s1436_s3 + $0x30] sm:$0xff]  }
  0x30   :  { %1088 = vmatprep.subr.bf16.mxu1 %v1216_v34  ;;  %v1260_v34 = vld [vmem:[%s1436_s3 + $0x38] sm:$0xff]  }
  0x32   :  { %1067 = vmatpush3.bf16.msra.mxu0 %v1217_v36 }
  0x33   :  { %1089 = vmatpush3.bf16.msra.mxu1 %v1218_v37  ;;  %1096 = vmatprep.subr.bf16.mxu0 %v1220_v41  ;;  %v974_v37 = vld [vmem:[%s1435_s2] ss:$0 sm:$0xff] }
  0x34   :  { %1118 = vmatprep.subr.bf16.mxu1 %v1221_v42 }
  0x35   :  { %648 = vmatmul.mubr.bf16.vlgmr.msra.gmra.mrb[0].mxu0 %v88_v45 }
  0x36   :  { %1097 = vmatpush3.bf16.msra.mxu0 %v1222_v46  ;;  %688 = vmatmul.mubr.bf16.vlgmr.msra.gmra.mrb[0].mxu1 %v90_v50 }
  0x37   :  { %1098 = vmatprep.subr.bf16.mxu0 %v1224_v51  ;;  %1119 = vmatpush3.bf16.msra.mxu1 %v1223_v49 }
  0x38   :  { %1120 = vmatprep.subr.bf16.mxu1 %v1225_v53  ;;  %727 = vmatprep.mubr.bf16.mxu0 %v93_v22 }
  0x39   :  { %767 = vmatprep.mubr.bf16.mxu1 %v95_v25 }
  0x3a   :  { %1099 = vmatpush3.bf16.msra.mxu0 %v1226_v54 }
  0x3b   :  { %1100 = vmatprep.subr.bf16.mxu0 %v1228_v56  ;;  %1121 = vmatpush3.bf16.msra.mxu1 %v1227_v55 }
  0x3c   :  { %1122 = vmatprep.subr.bf16.mxu1 %v1229_v57 }
  0x3e   :  { %1101 = vmatpush3.bf16.msra.mxu0 %v1230_v58 }
  0x3f   :  { %1102 = vmatprep.subr.bf16.mxu0 %v1232_v60  ;;  %1123 = vmatpush3.bf16.msra.mxu1 %v1231_v59 }
  0x40   :  { %1124 = vmatprep.subr.bf16.mxu1 %v1233_v61 }
  0x42   :  { %1103 = vmatpush3.bf16.msra.mxu0 %v1234_v62 }
  0x43   :  { %1104 = vmatprep.subr.bf16.mxu0 %v1236_v0  ;;  %1125 = vmatpush3.bf16.msra.mxu1 %v1235_v63  ;;  %v1262_v63 = vld [vmem:[%s1438_s5 + $0x8] sm:$0xff]   ;;  %v1039_v0 = vld [vmem:[%s1437_s4] ss:$0 sm:$0xff]  ;;  %s965_s5 = sshll.u32 %s1317_s17, 4  ;;  %s966_s5 = int_to_ptr.vmem [resolvable:$true] %s965_s5 }
  0x44   :  { %1126 = vmatprep.subr.bf16.mxu1 %v1237_v1  ;;  %s1285_s4 = scalar_lea.vmem %s966_s5, 32  ;;  %p1290_p9 = scmp.lt.s32.totalorder %s966_s5, %s966_s5 }
  0x45   :  { %p1286_p8 = scmp.ne.s32.totalorder %s966_s5, %s1285_s4  ;;  %p1291_p10 = scmp.lt.s32.totalorder %s1285_s4, %s1285_s4 }
  0x46   :  { %1105 = vmatpush3.bf16.msra.mxu0 %v1238_v2 }
  0x47   :  { %1106 = vmatprep.subr.bf16.mxu0 %v1240_v4  ;;  %1127 = vmatpush3.bf16.msra.mxu1 %v1239_v3  ;;  %p1292_p11 = por %p1291_p10, %p1290_p9 }
  0x48   :  { %1128 = vmatprep.subr.bf16.mxu1 %v1241_v5 }
  0x49   :  { %p1293_p12 = pnand %p1292_p11, %p1286_p8 }
  0x4a   :  { %1107 = vmatpush3.bf16.msra.mxu0 %v1242_v6 }
  0x4b   :  { %1108 = vmatprep.subr.bf16.mxu0 %v1244_v8  ;;  %1129 = vmatpush3.bf16.msra.mxu1 %v1243_v7  ;;  %v1048_v8 = vld [vmem:[%s1439_s6] ss:$0 sm:$0xff] }
  0x4c   :  { %1130 = vmatprep.subr.bf16.mxu1 %v1245_v9 }
  0x4e   :  { %1109 = vmatpush3.bf16.msra.mxu0 %v1246_v10 }
  0x4f   :  { %1110 = vmatprep.subr.bf16.mxu0 %v1248_v12  ;;  %1131 = vmatpush3.bf16.msra.mxu1 %v1247_v11 }
  0x50   :  { %1132 = vmatprep.subr.bf16.mxu1 %v1249_v13 }
  0x52   :  { %1111 = vmatpush3.bf16.msra.mxu0 %v1250_v14 }
  0x53   :  { %1133 = vmatpush3.bf16.msra.mxu1 %v1251_v16  ;;  %1152 = vmatprep.subr.bf16.mxu0 %v1315_v27 }
  0x54   :  { %1172 = vmatprep.subr.bf16.mxu1 %v1315_v27 }
  0x55   :  { %728 = vmatmul.mubr.bf16.vlgmr.msra.gmra.mrb[4].mxu0 %v92_v21 }
  0x56   :  { %768 = vmatmul.mubr.bf16.vlgmr.msra.gmra.mrb[4].mxu1 %v94_v24  ;;  %1153 = vmatpush3.bf16.msra.mxu0 %v1253_v26 }
  0x57   :  { %1154 = vmatprep.subr.bf16.mxu0 %v1315_v27  ;;  %1168 = vmatprep.mubr.msk.bf16.mxu0 %vm1316_vm0, %v1315_v27 }
  0x58   :  { %1176 = vmatprep.mubr.msk.bf16.mxu1 %vm1316_vm0, %v1315_v27  ;;  %1173 = vmatpush3.bf16.msra.mxu1 %v1261_v35 }
  0x59   :  { %1174 = vmatprep.subr.bf16.mxu1 %v1315_v27 }
  0x5a   :  { %1155 = vmatpush3.bf16.msra.mxu0 %v1254_v28 }
  0x5b   :  { %1156 = vmatprep.subr.bf16.mxu0 %v1315_v27 }
  0x5c   :  { %1175 = vmatpush3.bf16.msra.mxu1 %v1262_v63 }
  0x5e   :  { %1157 = vmatpush3.bf16.msra.mxu0 %v1255_v29 }
  0x5f   :  { %1158 = vmatprep.subr.bf16.mxu0 %v1315_v27 }
  0x62   :  { %1159 = vmatpush3.bf16.msra.mxu0 %v1256_v30 }
  0x63   :  { %1160 = vmatprep.subr.bf16.mxu0 %v1315_v27 }
  0x66   :  { %1161 = vmatpush3.bf16.msra.mxu0 %v1257_v31 }
  0x67   :  { %1162 = vmatprep.subr.bf16.mxu0 %v1315_v27 }
  0x6a   :  { %1163 = vmatpush3.bf16.msra.mxu0 %v1258_v32 }
  0x6b   :  { %1164 = vmatprep.subr.bf16.mxu0 %v1315_v27 }
  0x6e   :  { %1165 = vmatpush3.bf16.msra.mxu0 %v1259_v33 }
  0x6f   :  { %1166 = vmatprep.subr.bf16.mxu0 %v1315_v27 }
  0x72   :  { %1167 = vmatpush3.bf16.msra.mxu0 %v1260_v34 }
 0x108   :  { %v1068_v36 = vpop.f32.mrb[0].mxu0 }
 0x109   :  { %v1069_v38 = vpop.f32.mrb[1].mxu0  ;;  %v1090_v39 = vpop.f32.mrb[0].mxu1 }
 0x10a   :  { %v1070_v40 = vadd.f32 %v1069_v38, %v1068_v36  ;;  %v1071_v41 = vpop.f32.mrb[2].mxu0  ;;  %v1091_v42 = vpop.f32.mrb[1].mxu1 }
 0x10b   :  { %v1072_v43 = vpop.f32.mrb[3].mxu0  ;;  %v1092_v45 = vadd.f32 %v1091_v42, %v1090_v39  ;;  %v1093_v46 = vpop.f32.mrb[2].mxu1 }
 0x10c   :  { %v650_v44 = vadd.f32 %v1070_v40, %v974_v37  ;;  %v1094_v47 = vpop.f32.mrb[3].mxu1 }
 0x10e   :  { %v690_v48 = vadd.f32 %v1092_v45, %v650_v44 }
 0x128   :  { %v1112_v49 = vpop.f32.mrb[4].mxu0 }
 0x129   :  { %v1113_v50 = vpop.f32.mrb[5].mxu0  ;;  %v1134_v51 = vpop.f32.mrb[4].mxu1 }
 0x12a   :  { %v1114_v52 = vadd.f32 %v1113_v50, %v1112_v49  ;;  %v1115_v53 = vpop.f32.mrb[6].mxu0  ;;  %v1135_v54 = vpop.f32.mrb[5].mxu1 }
 0x12b   :  { %v1116_v55 = vpop.f32.mrb[7].mxu0  ;;  %v1136_v57 = vadd.f32 %v1135_v54, %v1134_v51  ;;  %v1137_v58 = vpop.f32.mrb[6].mxu1 }
 0x12c   :  { %v730_v56 = vadd.f32 %v1114_v52, %v690_v48  ;;  %v1138_v59 = vpop.f32.mrb[7].mxu1 }
 0x12e   :  { %v770_v60 = vadd.f32 %v1136_v57, %v730_v56 }
 0x130   :  { %v775_v61 = vmax.f32 %v770_v60, 0.0 }
 0x132   :  { %v776_v62 = vpack.c.bf16 %v775_v61, %v775_v61 }
 0x134   :  { %1169 = vmatmul.mubr.bf16.vlgmr.msra.gmra.mrb[8].mxu0 %v776_v62 }
 0x207   :  { %v882_v1 = vpop.f32.mrb[8].mxu0 }
 0x208   :  { %v883_v2 = vadd.f32 %v1039_v0, %v882_v1  ;;  %v1170_v3 = vpop.f32.mrb[9].mxu0 }
 0x209   :  { %v885_v4 = vpop.f32.mrb[10].mxu0 }
 0x20a   :  { %v888_v5 = vmax.f32 %v883_v2, 0.0  ;;  %v1171_v6 = vpop.f32.mrb[11].mxu0 }
 0x20c   :  { %v889_v7 = vpack.c.bf16 %v888_v5, %v888_v5 }
 0x20e   :  { %1177 = vmatmul.mubr.msk.bf16.vlgmr.msra.gmra.mrb[8].mxu1 %vm913_vm1, %v889_v7 }
 0x2e1   :  { %v951_v9 = vpop.f32.mrb[8].mxu1 }
 0x2e2   :  { %v952_v10 = vadd.f32 %v1048_v8, %v951_v9  ;;  %v1178_v11 = vpop.f32.mrb[9].mxu1 }
 0x2e3   :  { %v954_v12 = vpop.f32.mrb[10].mxu1 }
 0x2e4   :  { %v1179_v13 = vpop.f32.mrb[11].mxu1  ;;  %958 = vst.msk [vmem:[#allocation5] sm:$0x3] %vm957_vm2, %v952_v10 }
 0x2e5   :  { %1296 = shalt.err (!%p1293_p12)
}
 0x2e6   :  { %s1297_s6 = scalar_lea.hbm %s1440_s7, 32 }
 0x2e7   :  { %p1298_p13 = scmp.ne.s32.totalorder %s1440_s7, %s1297_s6  ;;  %p1301_p0 = scmp.lt.u32.totalorder %s1297_s6, %s1440_s7 }
 0x2e9   :  { %p1303_p1 = pnand %p1301_p0, %p1298_p13 }
 0x2eb   :  { %1306 = shalt.err (!%p1303_p1)
}
 0x2ec   :  { %968 = dma.vmem_to_hbm [thread:$0]  %s966_s5, 32, %s1440_s7, [#allocation4]  }
 0x2ed   :  { %1309 = dma.done.wait [#allocation4], 32  }
 0x2ee   :  { %1310 = vsyncadd [#allocation4], 4294967264 }
 0x2ef   :  { %972 = vsyncpa [#allocation3], 1 }
 0x2f0   :  { %973 = vsyncpa [#allocation4], 1 }

</bundles_post_ra>
